<compile_context>
chip_gen: v5e
topology: v5e:2x2
jax: 0.10.0
libtpu: 0.0.40
codegen_flags: <defaults>
</compile_context>

<pallas_src>
import functools

import jax
import jax.numpy as jnp
from jax import lax
from jax.experimental import pallas as pl
from jax.experimental.pallas import tpu as pltpu


def _csra_kernel(x_ref, w_ref, o_ref, *, T, hw_valid):
    """One batch element per grid step.

    x_ref: (Cin, HWp)  -- channels on sublanes, spatial (lane-dense) on lanes
    w_ref: (K, Cin)    -- constant block index -> stays resident across the grid
    o_ref: (1, K)
    """
    x = x_ref[...]
    w = w_ref[...]

    # 1x1 conv == one stationary-weight 2-D MXU matmul with f32 accumulation.
    # (No per-batch broadcast of w, no batched dot: the batch lives on the grid.)
    score = jnp.dot(w, x, preferred_element_type=jnp.float32)       # (K, HWp) f32

    padded = score.shape[-1] != hw_valid
    if padded:
        # The wrapper zero-padded HW up to a lane multiple, so pad columns of
        # `score` are exactly 0.  Mask them out of the reductions explicitly so
        # neither the max branch nor the softmax sums observe padded lanes.
        valid = lax.broadcasted_iota(jnp.int32, score.shape, 1) < hw_valid

    if T == 99:
        s = jnp.where(valid, score, -jnp.inf) if padded else score
        att = jnp.max(s, axis=-1)                                    # (K,)
    else:
        s = score * T
        # The shift only needs to be an upper bound for stability; softmax is
        # shift-invariant, so including the (exactly zero) pad columns in the
        # max is harmless and needs no mask.
        m = jnp.max(s, axis=-1, keepdims=True)                       # (K, 1)
        e = jnp.exp(s - m)                                           # (K, HWp)
        if padded:
            e = jnp.where(valid, e, 0.0)
        num = jnp.sum(score * e, axis=-1)                            # (K,)
        den = jnp.sum(e, axis=-1)                                    # (K,)
        # Exact divide: only K (<= 8) quotients remain after the reductions, so
        # the approx EUP reciprocal buys nothing and would cost accuracy.
        att = num / den

    o_ref[...] = att.astype(o_ref.dtype)[None, :]                    # (1, K) store


def csra_forward(x_nchw, weight, T, lam, *, compute_dtype=jnp.bfloat16):
    """CSRA forward.  x_nchw: (B, Cin, H, W), weight: (K, Cin, 1, 1) -> (B, K).

    `T` must be a static Python number (the T == 99 branch is resolved at trace
    time, mirroring the PyTorch module attribute).  The reference forward
    returns only att_logit (base_logit is dead code), so `lam` is accepted but
    unused.  Inputs are cast to `compute_dtype` (bf16 by default); all
    post-matmul softmax math is f32.
    """
    B, Cin, H, W = x_nchw.shape
    K = weight.shape[0]
    HW = H * W
    HWp = ((HW + 127) // 128) * 128          # lane-align the reduction axis

    x = x_nchw.reshape(B, Cin, HW).astype(compute_dtype)   # free reshape of NCHW
    w = weight.reshape(K, Cin).astype(compute_dtype)
    if HWp != HW:
        # Zero-pad the spatial axis so the kernel's lane dim is 128-aligned and
        # the pad contents are deterministic (masked out inside the kernel).
        # TODO(synk): at backbone scale, drop the pad and rely on Mosaic's
        # masked unaligned reductions once validated, to save the extra DMA.
        x = jnp.pad(x, ((0, 0), (0, 0), (0, HWp - HW)))

    # One image per grid step:
    #  * a single non-batched (K,Cin)@(Cin,HWp) matmul per step, weight resident,
    #  * B >= 2 "parallel" steps -> pipelined x DMA and both v7x TensorCores used.
    # If the surrounding model runs the multi-head CSRA variant, fuse all heads'
    # (K, Cin) weights into one (K_total, Cin) matrix here to raise MXU occupancy.
    grid = (B,)

    itemsize = jnp.dtype(compute_dtype).itemsize
    vmem_need = (2 * Cin * HWp * itemsize      # double-buffered x block
                 + 2 * K * Cin * itemsize      # w block (double-buffered)
                 + 2 * K * 4                   # output block
                 + 2 * K * HWp * 4)            # f32 score / e temporaries
    params = dict(dimension_semantics=("parallel",))
    if vmem_need > 12 * 1024 * 1024:
        # Backbone-scale maps can blow v5e's 16 MiB default scoped-VMEM limit;
        # request explicitly, staying well under v7x's 64 MiB physical VMEM.
        params["vmem_limit_bytes"] = min(int(vmem_need * 3 // 2), 56 * 1024 * 1024)
    # TODO(synk): if a single (Cin, HWp) slab still does not fit, add an HW grid
    # axis (innermost, "arbitrary") with online-softmax (m, num, den) VMEM scratch
    # initialized/finalized via pl.when, keeping the B axis "parallel".

    out = pl.pallas_call(
        functools.partial(_csra_kernel, T=T, hw_valid=HW),
        out_shape=jax.ShapeDtypeStruct((B, 1, K), jnp.float32),
        grid=grid,
        in_specs=[
            pl.BlockSpec((None, Cin, HWp), lambda b: (b, 0, 0)),  # x: (Cin, HWp) per step
            pl.BlockSpec((K, Cin), lambda b: (0, 0)),             # w: constant -> resident
        ],
        out_specs=pl.BlockSpec((None, 1, K), lambda b: (b, 0, 0)),
        compiler_params=pltpu.CompilerParams(**params),
    )(x, w)
    return out.reshape(B, K)


def csra_reference(x_nchw, weight, T, lam, *, compute_dtype=jnp.bfloat16):
    """Pure-JAX reference mirroring the PyTorch forward (same input cast)."""
    B, Cin, H, W = x_nchw.shape
    K = weight.shape[0]
    x = x_nchw.reshape(B, Cin, H * W).astype(compute_dtype)
    w = weight.reshape(K, Cin).astype(compute_dtype)
    score = jnp.einsum("kc,bch->bkh", w, x, preferred_element_type=jnp.float32)
    if T == 99:
        return jnp.max(score, axis=2)
    soft = jax.nn.softmax(score * T, axis=2)
    return jnp.sum(score * soft, axis=2)


if __name__ == "__main__":
    B, Cin, K = 2, 32, 8
    T, lam = 2, 0.1

    key = jax.random.PRNGKey(0)
    kx, kw, kx2 = jax.random.split(key, 3)
    # Deterministic init for the 1x1 conv weight (num_classes, input_dim, 1, 1).
    weight = (jax.random.normal(kw, (K, Cin, 1, 1), dtype=jnp.float32)
              * (1.0 / jnp.sqrt(Cin)))

    # 16x16 feature map: HW = 256 (lane-aligned, no padding path).
    x = jax.random.normal(kx, (B, Cin, 16, 16), dtype=jnp.float32)

    out = jax.block_until_ready(csra_forward(x, weight, T, lam))
    ref = csra_reference(x, weight, T, lam)
    assert out.shape == (B, K)
    assert jnp.allclose(out, ref, atol=1e-4, rtol=1e-4), "mismatch (T=2, HW=256)"

    out_max = jax.block_until_ready(csra_forward(x, weight, 99, lam))
    ref_max = csra_reference(x, weight, 99, lam)
    assert jnp.allclose(out_max, ref_max, atol=1e-4, rtol=1e-4), "mismatch (T=99, HW=256)"

    # 7x7 feature map: HW = 49 (not a multiple of 128) -> exercises the
    # zero-pad + in-kernel masking path for both reduction branches.
    x7 = jax.random.normal(kx2, (B, Cin, 7, 7), dtype=jnp.float32)

    out7 = jax.block_until_ready(csra_forward(x7, weight, T, lam))
    ref7 = csra_reference(x7, weight, T, lam)
    assert jnp.allclose(out7, ref7, atol=1e-4, rtol=1e-4), "mismatch (T=2, HW=49)"

    out7m = jax.block_until_ready(csra_forward(x7, weight, 99, lam))
    ref7m = csra_reference(x7, weight, 99, lam)
    assert jnp.allclose(out7m, ref7m, atol=1e-4, rtol=1e-4), "mismatch (T=99, HW=49)"

    print("KERNEL_OK")
</pallas_src>

<mosaic_0001>
module attributes {stable_mosaic.version = 11 : i64} {
  func.func @_csra_kernel(%arg0: i32, %arg1: memref<1x32x256xbf16, #tpu.memory_space<vmem>>, %arg2: memref<8x32xbf16, #tpu.memory_space<vmem>>, %arg3: memref<1x1x8xf32, #tpu.memory_space<vmem>>) attributes {dimension_semantics = [#tpu.dimension_semantics<parallel>], iteration_bounds = array<i64: 2>, scalar_prefetch = 0 : i64, scratch_operands = 0 : i64, tpu.core_type = #tpu.core_type<tc>, window_params = [{transform_indices = @transform_0, window_bounds = array<i64: 1, 32, 256>}, {pipeline_mode = #tpu.pipeline_mode<synchronous>, transform_indices = @transform_1, window_bounds = array<i64: 8, 32>}, {transform_indices = @transform_2, window_bounds = array<i64: 1, 1, 8>}]} {
    %c0 = arith.constant 0 : index
    %c0_0 = arith.constant 0 : index
    %c0_1 = arith.constant 0 : index
    %0 = vector.load %arg1[%c0, %c0_0, %c0_1] : memref<1x32x256xbf16, #tpu.memory_space<vmem>>, vector<1x32x256xbf16>
    %1 = vector.shape_cast %0 : vector<1x32x256xbf16> to vector<32x256xbf16>
    %c0_2 = arith.constant 0 : index
    %c0_3 = arith.constant 0 : index
    %2 = vector.load %arg2[%c0_2, %c0_3] : memref<8x32xbf16, #tpu.memory_space<vmem>>, vector<8x32xbf16>
    %cst = arith.constant dense<0.000000e+00> : vector<8x256xf32>
    %3 = tpu.matmul %2, %1, %cst {dimension_numbers = #tpu.dot_dimension_numbers<[1], [0], [0], [1], [0, 0, 1, 1], [], []>} : vector<8x32xbf16>, vector<32x256xbf16>, vector<8x256xf32> -> vector<8x256xf32>
    %cst_4 = arith.constant 2.000000e+00 : f32
    %4 = vector.broadcast %cst_4 : f32 to vector<8x256xf32>
    %5 = arith.mulf %3, %4 : vector<8x256xf32>
    %cst_5 = arith.constant dense<0xFF800000> : vector<8xf32>
    %6 = vector.multi_reduction <maximumf>, %5, %cst_5 [1] : vector<8x256xf32> to vector<8xf32>
    %7 = vector.shape_cast %6 : vector<8xf32> to vector<8x1xf32>
    %8 = vector.broadcast %7 : vector<8x1xf32> to vector<8x256xf32>
    %9 = arith.subf %5, %8 : vector<8x256xf32>
    %10 = math.exp %9 : vector<8x256xf32>
    %11 = arith.mulf %3, %10 : vector<8x256xf32>
    %cst_6 = arith.constant dense<0.000000e+00> : vector<8xf32>
    %12 = vector.multi_reduction <add>, %11, %cst_6 [1] : vector<8x256xf32> to vector<8xf32>
    %cst_7 = arith.constant dense<0.000000e+00> : vector<8xf32>
    %13 = vector.multi_reduction <add>, %10, %cst_7 [1] : vector<8x256xf32> to vector<8xf32>
    %14 = arith.divf %12, %13 : vector<8xf32>
    %15 = vector.shape_cast %14 : vector<8xf32> to vector<1x8xf32>
    %c0_8 = arith.constant 0 : index
    %c0_9 = arith.constant 0 : index
    %c0_10 = arith.constant 0 : index
    %16 = vector.load %arg3[%c0_8, %c0_9, %c0_10] : memref<1x1x8xf32, #tpu.memory_space<vmem>>, vector<1x1x8xf32>
    %17 = vector.shape_cast %16 : vector<1x1x8xf32> to vector<1x8xf32>
    %18 = vector.shape_cast %15 : vector<1x8xf32> to vector<1x1x8xf32>
    tpu.vector_store %arg3[%c0_8, %c0_9, %c0_10], %18 {strides = array<i32>} : memref<1x1x8xf32, #tpu.memory_space<vmem>>, vector<1x1x8xf32>,
    return
  }
  func.func @transform_0(%arg0: i32) -> (i32, i32, i32) {
    %c0_i32 = arith.constant 0 : i32
    %c0_i32_0 = arith.constant 0 : i32
    %c0_i32_1 = arith.constant 0 : i32
    return %arg0, %c0_i32, %c0_i32_0 : i32, i32, i32
  }
  func.func @transform_1(%arg0: i32) -> (i32, i32) {
    %c0_i32 = arith.constant 0 : i32
    %c0_i32_0 = arith.constant 0 : i32
    %c0_i32_1 = arith.constant 0 : i32
    return %c0_i32, %c0_i32_0 : i32, i32
  }
  func.func @transform_2(%arg0: i32) -> (i32, i32, i32) {
    %c0_i32 = arith.constant 0 : i32
    %c0_i32_0 = arith.constant 0 : i32
    %c0_i32_1 = arith.constant 0 : i32
    return %arg0, %c0_i32, %c0_i32_0 : i32, i32, i32
  }
}

</mosaic_0001>

<bundles_post_ra>
// kernel: tpu_custom_call.1
= control target key start
LH: loop header
LB: loop body
LE: loop exit
PB: predicated region body
PF: predicated region fallthrough
CT: control target
= control target key end

     0   :  { %7 = vsyncpa [#allocation3], 0  ;;  %s757_s0 = inlined_call_operand.hbm [shape: bf16[2,32,256], index: 0, kind: input, shape index: {}]   ;;  %s758_s1 = inlined_call_operand.hbm [shape: bf16[8,32], index: 1, kind: input, shape index: {}]   ;;  %s759_s2 = inlined_call_operand.hbm [shape: f32[2,1,8], index: 2, kind: output, shape index: {}]  }
   0x1   :  { %9 = vsyncpa [#allocation3 + $0x1], 0 }
   0x2   :  { %10 = vsyncpa [#allocation6], 0 }
   0x3   :  { %11 = vsyncpa [#allocation4], 0 }
   0x4   :  { %13 = vsyncpa [#allocation4 + $0x1], 0  ;;  %s614_s9 = smov 0   ;;  %s616_s10 = smov 0  }
   0x5   :  { %s618_s11 = smov 0   ;;  %s620_s12 = smov 0  }
   0x6 LB: > { %s635_s13 = sadd.s32 4294967295, %s594_s12   ;;  %s364_s14 = sadd.s32 4294967294, %s594_s12   ;;  %s594_s12 = sphi %s620_s12, %s770_s12   ;;  %s590_s11 = sphi %s618_s11, %s769_s11   ;;  %s586_s10 = sphi %s616_s10, %s768_s10   ;;  %s582_s9 = sphi %s614_s9, %s767_s9  }
   0x7   : > { %s639_s15 = sadd.s32 1, %s594_s12   ;;  %s26_s16 = sadd.s32 1, %s590_s11 }
   0x8   : > { %s23_s17 = ssub.s32 %s594_s12, %s639_s15  ;;  %p33_p0 = scmp.ne.s32.totalorder %s590_s11, %s586_s10 }
   0x9   : > { %p24_p1 = scmp.eq.s32.totalorder %s23_s17, 0  ;;  %p34_p2 = scmp.eq.s32.totalorder %s594_s12, 0 }
   0xa   : > { %p39_p3 = scmp.ne.s32.totalorder %s586_s10, %s582_s9  ;;  %p40_p4 = scmp.eq.s32.totalorder %s635_s13, 0 }
   0xb   : > { %s651_s18 = scalar_select %p24_p1, %s590_s11, %s26_s16  }
   0xc   : > { %p653_p5 = por %p34_p2, %p33_p0  ;;  %p659_p6 = por %p40_p4, %p39_p3 }
   0xd   : > { %p84_p7 = scmp.eq.s32.totalorder %s635_s13, 1  ;;  %p90_p8 = scmp.eq.s32.totalorder %s364_s14, 1 }
   0xe   : > { %p365_p9 = scmp.ge.s32.totalorder %s594_s12, 1  ;;  %p97_p10 = scmp.lt.s32.totalorder %s594_s12, 3 }
   0xf   : > { %p666_p11 = por %p84_p7, %p33_p0  ;;  %p670_p12 = por %p90_p8, %p39_p3 }
  0x10   : > { %p674_p13 = pnand %p365_p9, %p97_p10  ;;  %s109_s26 = sshll.u32 %s758_s1, 4  ;;  %s110_s26 = int_to_ptr.hbm [resolvable:$true] %s109_s26 }
  0x11   : > { %s596_s27 = smov [#allocation5]   ;;  %p420_p3 = scmp.lt.s32.totalorder %s594_s12, 2 }
  0x12   : > { %p407_p1 = pneg %p674_p13  ;;  %s111_s28 = sshll.u32 %s596_s27, 4  ;;  %s112_s28 = int_to_ptr.vmem [resolvable:$true] %s111_s28 }
  0x13   : > { %s122_s29 = sand.u32 1, %s590_s11   ;;  %p690_p7 = pnand %p420_p3, %p653_p5 }
  0x14   : > { %p408_p2 = pnand %p407_p1, %p40_p4  ;;  %s368_s3 = sshll.u32 %s122_s29, 5 }
  0x15   : > { %s394_s4 = sshll.u32 %s594_s12, 5  ;;  %s126_s14 = scalar_lea.vmem [#allocation2], %s368_s3 }
  0x16   : > { %410 = dma.hbm_to_vmem [thread:$0]  (!%p408_p2), %s110_s26, 64, %s112_s28, [#allocation6]  }
  0x17   : > { %s131_s7 = scalar_lea.hbm %s757_s0, %s394_s4  ;;  %s134_s16 = sshll.u32 %s126_s14, 4  ;;  %s135_s16 = int_to_ptr.vmem [resolvable:$true] %s134_s16 }
  0x18   : > { %s132_s8 = sshll.u32 %s131_s7, 4  ;;  %s123_s17 = scalar_lea.sflag [#allocation3], %s122_s29  ;;  %s133_s8 = int_to_ptr.hbm [resolvable:$true] %s132_s8 }
  0x19   : > { %s494_s24 = sshra.s32 %s133_s8, 4  ;;  %p498_p8 = pneg %p690_p7  ;;  %s495_s24 = int_to_ptr.hbm [resolvable:$true] %s494_s24 }
  0x1a   : > { %s496_s19 = scalar_lea.hbm %s495_s24, 32  ;;  %s501_s27 = scalar_lea.hbm %s757_s0, 64 }
  0x1b   : > { %p497_p5 = scmp.ne.s32.totalorder %s495_s24, %s496_s19  ;;  %p502_p1 = scmp.lt.s32.totalorder %s495_s24, %s757_s0 }
  0x1c   : > { %p503_p2 = scmp.lt.s32.totalorder %s501_s27, %s496_s19 }
  0x1d   : > { %p499_p9 = pnand %p498_p8, %p497_p5 }
  0x1e   : > { %p504_p3 = por %p503_p2, %p502_p1 }
  0x1f   : > { %p500_p10 = pneg %p499_p9 }
  0x21   : > { %p505_p0 = pnand %p504_p3, %p500_p10 }
  0x23   : > { %508 = shalt.err (!%p505_p0)
}
  0x24   : > { %s597_s29 = smov 128   ;;  %s598_s3 = smov 8  }
  0x25   : > { %414 = dma.hbm_to_vmem [thread:$0]  (!%p690_p7), %s133_s8, 512, %s135_s16, %s123_s17, %s597_s29, %s597_s29, %s598_s3  }
  0x26   : > { %146 = sbr.rel (%p674_p13) target bundleno = 457 (0x1c9), region = 28  ;;  %s711_s5 = sand.u32 (!%p674_p13), 1, %s586_s10  }
  0x27   : > { %s372_s6 = sshll.u32 (!%p674_p13), %s711_s5, 5  ;;  %s149_s7 = scalar_lea.sflag (!%p674_p13), [#allocation3], %s711_s5 }
  0x28   : > { %s152_s14 = scalar_lea.vmem (!%p674_p13), [#allocation2], %s372_s6 }
  0x2b   : > { %569 = dma.done.wait (%p659_p6), %s149_s7, 512  }
  0x2c   : > { %571 = vsyncadd (%p659_p6), %s149_s7, 4294966784 }
  0x2d   : > { %573 = dma.done.wait (%p40_p4), [#allocation6], 64  }
  0x2e   : > { %575 = vsyncadd (%p40_p4), [#allocation6], 4294967232  ;;  %v384_v0 = vld [vmem:[%s152_s14 + $0x10] sm:$0xf]  ;;  %v398_v1 = vld [vmem:[%s152_s14 + $0x14] sm:$0xf0]  ;;  %v269_v38 = vlaneseq  ;;  %s284_s30 = scalar_lea.hbm %s759_s2, %s635_s13 }
  0x2f   : > { %v397_v2 = vld [vmem:[%s152_s14 + $0x14] sm:$0xf]  ;;  %v385_v3 = vor.u32 %v398_v1, %v384_v0  ;;  %v386_v4 = vld [vmem:[%s152_s14 + $0x18] sm:$0xf0]  ;;  %v376_v5 = vld [vmem:[%s152_s14] sm:$0xf] }
  0x30   : > { %v396_v6 = vld [vmem:[%s152_s14 + $0x4] sm:$0xf0]  ;;  %v389_v7 = vor.u32 %v397_v2, %v386_v4  ;;  %v395_v8 = vld [vmem:[%s152_s14 + $0x4] sm:$0xf]  ;;  %v378_v9 = vld [vmem:[%s152_s14 + $0x8] sm:$0xf0] }
  0x31   : > { %214 = vmatpush.bf16.msra.mxu0 %v385_v3  ;;  %v377_v10 = vor.u32 %v396_v6, %v376_v5  ;;  %v381_v11 = vor.u32 %v395_v8, %v378_v9  ;;  %v183_v12 = vld [vmem:[#allocation5] sm:$0xf]  ;;  %vm204_vm0 = vcmask 261120   ;;  %v270_v42 = vand.u32 127, %v269_v38  ;;  %s177_s8 = scalar_lea.vmem [#allocation7], %s711_s5  ;;  %s288_s17 = sshll.u32 %s284_s30, 4  ;;  %s289_s17 = int_to_ptr.hbm [resolvable:$true] %s288_s17 }
  0x32   : > { %227 = vmatpush.bf16.msra.mxu1 %v389_v7  ;;  %s286_s16 = sshll.u32 %s177_s8, 4  ;;  %vm273_vm5 = vcmask 57344   ;;  %s276_s24 = scalar_lea.sflag [#allocation4], %s711_s5  ;;  %s287_s16 = int_to_ptr.vmem [resolvable:$true] %s286_s16 }
  0x33   : > { %s538_s13 = sshra.s32 %s289_s17, 4  ;;  %s544_s27 = scalar_lea.hbm %s759_s2, 2  ;;  %s539_s13 = int_to_ptr.hbm [resolvable:$true] %s538_s13 }
  0x34   : > { %s540_s19 = scalar_lea.hbm %s539_s13, 1  ;;  %p545_p0 = scmp.lt.s32.totalorder %s539_s13, %s759_s2 }
  0x35   : > { %215 = vmatpush.bf16.msra.mxu0 %v377_v10  ;;  %p541_p4 = scmp.ne.s32.totalorder %s539_s13, %s540_s19  ;;  %p546_p7 = scmp.lt.s32.totalorder %s544_s27, %s540_s19 }
  0x36   : > { %228 = vmatpush.bf16.msra.mxu1 %v381_v11 }
  0x37   : > { %p542_p6 = pnand %p541_p4, %p666_p11  ;;  %p547_p5 = por %p546_p7, %p545_p0 }
  0x38   : > { %390 = vmatmul.msk.bf16.vlgmr.msra.gmra.mxu0 %vm204_vm0, %v183_v12 }
  0x39   : > { %391 = vmatmul.msk.bf16.vlgmr.msra.gmra.mxu1 %vm204_vm0, %v183_v12  ;;  %p543_p13 = pneg %p542_p6 }
  0x3b   : > { %p548_p8 = pnand %p547_p5, %p543_p13 }
  0xb5   : > { %v217_v13 = vpop.f32.mrf.mxu0 }
  0xb6   : > { %v234_v14 = vmul.f32 2.0, %v217_v13  ;;  %v230_v15 = vpop.f32.mrf.mxu1 }
  0xb7   : > { %v235_v16 = vmul.f32 2.0, %v230_v15 }
  0xb9   : > { %v236_v17 = vmax.f32 %v234_v14, %v235_v16 }
  0xbb   : > { %237 = vmax.xlane.f32.xlu0 %v236_v17 }
  0xbd   : > { %v219_v18 = vpop.f32.mrf.mxu0 }
  0xbe   : > { %v232_v19 = vpop.f32.mrf.mxu1 }
 0x12e   : > { %v238_v20 = vpop.xlane.xlu0 %237 }
 0x12f   : > { %v239_v21 = vsub.f32 %v234_v14, %v238_v20  ;;  %v240_v22 = vsub.f32 %v235_v16, %v238_v20 }
 0x131   : > { %v241_v23 = vmul.f32 1.442695, %v239_v21  ;;  %v243_v24 = vmul.f32 1.442695, %v240_v22 }
 0x133   : > { %458 = vpow2.f32 %v241_v23 }
 0x134   : > { %460 = vpow2.f32 %v243_v24 }
 0x139   : > { %v459_v25 = vpop.eup %458 }
 0x13a   : > { %v461_v26 = vpop.eup %460  ;;  %v245_v27 = vmul.f32 %v459_v25, %v217_v13 }
 0x13b   : > { %v250_v28 = vadd.f32 %v461_v26, %v459_v25  ;;  %v246_v29 = vmul.f32 %v461_v26, %v230_v15 }
 0x13d   : > { %251 = vadd.xlane.f32.xlu0 %v250_v28  ;;  %v247_v30 = vadd.f32 %v246_v29, %v245_v27 }
 0x13f   : > { %248 = vadd.xlane.f32.xlu1 %v247_v30 }
 0x1b0   : > { %v252_v31 = vpop.xlane.xlu0 %251 }
 0x1b1   : > { %462 = vrcp.f32 %v252_v31  ;;  %v264_v35 = vand.u32 2147483648, %v252_v31  ;;  %v262_v37 = vand.u32 2147483647, %v252_v31  ;;  %vm258_vm2 = vweird.f32 %v252_v31 }
 0x1b2   : > { %v249_v44 = vpop.xlane.xlu1 %248 }
 0x1b3   : > { %v265_v40 = vor.u32 1.1754944e-38, %v264_v35  ;;  %vm263_vm4 = vcmp.eq.f32.partialorder %v262_v37, 8.507059e+37 }
 0x1b7   : > { %v463_v32 = vpop.eup %462 }
 0x1b8   : > { %v254_v33 = vmul.f32 %v463_v32, %v252_v31  ;;  %vm259_vm1 = vweird.f32 %v463_v32 }
 0x1b9   : > { %vm260_vm3 = vmor %vm258_vm2, %vm259_vm1 }
 0x1ba   : > { %v255_v34 = vsub.f32 1.0, %v254_v33 }
 0x1bc   : > { %v256_v36 = vmul.f32 %v463_v32, %v255_v34 }
 0x1be   : > { %v257_v39 = vadd.f32 %v463_v32, %v256_v36 }
 0x1c0   : > { %v261_v41 = vsel %vm260_vm3, %v463_v32, %v257_v39 }
 0x1c1   : > { %v266_v43 = vsel %vm263_vm4, %v265_v40, %v261_v41 }
 0x1c2   : > { %v267_v45 = vmul.f32 %v266_v43, %v249_v44 }
 0x1c4   : > { %v271_v46 = vperm.slane %v267_v45, %v270_v42 }
 0x1c6   : > { %274 = vst.msk [vmem:[%s177_s8] sm:$0x1] %vm273_vm5, %v271_v46 }
 0x1c7   : > { %551 = shalt.err (!%p548_p8)
}
 0x1c8   : > { %405 = dma.vmem_to_hbm [thread:$0]  (%p666_p11), %s287_s16, 16, %s289_s17, %s276_s24  }
 0x1c9 PF: > { %s300_s29 = sand.u32 1, %s582_s9   ;;  %p766_p9 = scmp.ge.s32.totalorder %s594_s12, 2 }
 0x1ca   : > { %s301_s3 = scalar_lea.sflag [#allocation4], %s300_s29 }
 0x1cb   : > { %p416_p10 = pnand %p766_p9, %p670_p12 }
 0x1cd   : > { %p417_p1 = pneg %p416_p10 }
 0x1cf   : > { %577 = dma.done.wait (%p417_p1), %s301_s3, 16  }
 0x1d0   : > { %579 = vsyncadd (%p417_p1), %s301_s3, 4294967280  ;;  %p16_p2 = scmp.ge.s32.totalorder %s639_s15, 4   ;;  %s767_s9 = smov %s586_s10 }
 0x1d1   : > { %s768_s10 = smov %s590_s11  ;;  %s769_s11 = smov %s651_s18 }
 0x1d2   : > { %s770_s12 = smov %s639_s15  ;;  %18 = sbr.rel (!%p16_p2) target bundleno = 6 (0x6), region = 77 }
 0x1d7   :  { %306 = vsyncpa [#allocation3], 1 }
 0x1d8   :  { %308 = vsyncpa [#allocation3 + $0x1], 1 }
 0x1d9   :  { %309 = vsyncpa [#allocation6], 1 }
 0x1da   :  { %310 = vsyncpa [#allocation4], 1 }
 0x1db   :  { %312 = vsyncpa [#allocation4 + $0x1], 1 }

</bundles_post_ra>
